<compile_context>
chip_gen: v6e
topology: v6e:2x2x1
jax: 0.10.0
libtpu: 0.0.40
codegen_flags: <defaults>
</compile_context>

<pallas_src>
import functools
import math

import numpy as np
import jax
import jax.numpy as jnp
from jax.experimental import pallas as pl
from jax.experimental.pallas import tpu as pltpu

D_MODEL = 32
NHEAD = 4
HEAD_DIM = D_MODEL // NHEAD
LQ = 8          # number of queries (tgt length)
LK = 16         # memory length
N = 2           # batch
EPS = 1e-5      # nn.LayerNorm default eps


def cross_attn_kernel(*refs, nhead, has_qpos, has_pos):
    """One grid step == one batch element. Refs (in order):
       tgt (LQ,D) [, qpos (LQ,D)], mem (LK,D) [, pos (LK,D)],
       wqkv (3,D,D) bf16, bqkv (3,1,D) f32, wout (D,D) bf16,
       bout (1,D), ln_g (1,D), ln_b (1,D), out (LQ,D)."""
    idx = 0
    tgt_ref = refs[idx]; idx += 1
    qpos_ref = None
    if has_qpos:
        qpos_ref = refs[idx]; idx += 1
    mem_ref = refs[idx]; idx += 1
    pos_ref = None
    if has_pos:
        pos_ref = refs[idx]; idx += 1
    wqkv_ref, bqkv_ref, wout_ref, bout_ref, lng_ref, lnb_ref, out_ref = refs[idx:]

    f32 = jnp.float32
    bf16 = jnp.bfloat16

    tgt = tgt_ref[...].astype(f32)                               # (LQ, D)
    q_in = (tgt + qpos_ref[...].astype(f32)) if has_qpos else tgt
    mem = mem_ref[...].astype(f32)                               # (LK, D)
    k_in = (mem + pos_ref[...].astype(f32)) if has_pos else mem

    lq, d = tgt.shape
    hd = d // nhead

    wq, wk, wv = wqkv_ref[0], wqkv_ref[1], wqkv_ref[2]           # (D, D) bf16 each
    bq, bk, bv = bqkv_ref[0], bqkv_ref[1], bqkv_ref[2]           # (1, D) f32 each

    # Full-width input projections: (R, D) @ (D, D), bf16 operands, f32 accumulate.
    # 1/sqrt(head_dim) is already folded into wq / bq by prepare_params().
    q = jnp.dot(q_in.astype(bf16), wq, preferred_element_type=f32) + bq   # (LQ, D)
    k = jnp.dot(k_in.astype(bf16), wk, preferred_element_type=f32) + bk   # (LK, D)
    v = jnp.dot(mem.astype(bf16), wv, preferred_element_type=f32) + bv    # (LK, D)

    qb = q.astype(bf16)
    kb = k.astype(bf16)
    vb = v.astype(bf16)

    # Per-head attention on contiguous hd-wide lane slices (static unroll).
    # Contraction over the hd=8 slice is inherent to MHA at this d_model.
    contract_last = (((1,), (1,)), ((), ()))     # A @ B.T
    head_outs = []
    for h in range(nhead):
        sl = slice(h * hd, (h + 1) * hd)
        s = jax.lax.dot_general(qb[:, sl], kb[:, sl], contract_last,
                                preferred_element_type=f32)               # (LQ, LK)
        m = jnp.max(s, axis=-1, keepdims=True)
        p = jnp.exp(s - m)
        p = p * pl.reciprocal(jnp.sum(p, axis=-1, keepdims=True), approx=True)
        head_outs.append(jnp.dot(p.astype(bf16), vb[:, sl],
                                 preferred_element_type=f32))              # (LQ, hd)
    o = jnp.concatenate(head_outs, axis=-1)                                # (LQ, D)

    # Single output projection (head-sum folded into one matmul).
    proj = jnp.dot(o.astype(bf16), wout_ref[...], preferred_element_type=f32)
    proj = proj + bout_ref[...]

    # Residual + LayerNorm (dropout is identity at p=0.0); one-pass variance.
    y = tgt + proj
    mean = jnp.mean(y, axis=-1, keepdims=True)
    var = jnp.mean(y * y, axis=-1, keepdims=True) - mean * mean
    y = (y - mean) * jax.lax.rsqrt(var + EPS)
    out_ref[...] = (y * lng_ref[...] + lnb_ref[...]).astype(out_ref.dtype)


def prepare_params(params):
    """One-time host-side layout work:
       split packed in_proj into full-width (D, D) pre-transposed blocks, fold
       1/sqrt(head_dim) into Wq/bq, pre-transpose out_proj, pre-cast MXU weights
       to bfloat16 (biases / LN params stay f32)."""
    w_in, b_in, w_out, b_out, ln_g, ln_b = params
    d = w_out.shape[0]
    hd = d // NHEAD
    scale = 1.0 / math.sqrt(hd)

    w_qkv = jnp.stack([(w_in[0:d] * scale).T,
                       w_in[d:2 * d].T,
                       w_in[2 * d:3 * d].T]).astype(jnp.bfloat16)        # (3, D, D)
    b_qkv = jnp.stack([b_in[0:d] * scale,
                       b_in[d:2 * d],
                       b_in[2 * d:3 * d]]).reshape(3, 1, d)              # (3, 1, D) f32
    w_out_t = jnp.transpose(w_out, (1, 0)).astype(jnp.bfloat16)          # (D, D)
    return (w_qkv, b_qkv, w_out_t,
            b_out.reshape(1, d), ln_g.reshape(1, d), ln_b.reshape(1, d))


def cross_attention_layer(tgt, memory, prepared, pos=None, query_pos=None):
    """tgt: (LQ, N, D) seq-first, memory: (LK, N, D); returns (LQ, N, D)."""
    lq, n, d = tgt.shape
    lk = memory.shape[0]
    w_qkv, b_qkv, w_out_t, b_out2, ln_g2, ln_b2 = prepared

    # Batch-major relayout so each grid step handles exactly one batch element.
    tgt_b = jnp.transpose(tgt, (1, 0, 2))            # (N, LQ, D)
    mem_b = jnp.transpose(memory, (1, 0, 2))         # (N, LK, D)

    has_qpos = query_pos is not None
    has_pos = pos is not None

    args = [tgt_b]
    in_specs = [pl.BlockSpec((None, lq, d), lambda b: (b, 0, 0))]
    if has_qpos:
        args.append(jnp.transpose(query_pos, (1, 0, 2)))
        in_specs.append(pl.BlockSpec((None, lq, d), lambda b: (b, 0, 0)))
    args.append(mem_b)
    in_specs.append(pl.BlockSpec((None, lk, d), lambda b: (b, 0, 0)))
    if has_pos:
        args.append(jnp.transpose(pos, (1, 0, 2)))
        in_specs.append(pl.BlockSpec((None, lk, d), lambda b: (b, 0, 0)))

    # Weights: full arrays, same block every grid step (stay resident in VMEM).
    args += [w_qkv, b_qkv, w_out_t, b_out2, ln_g2, ln_b2]
    in_specs += [
        pl.BlockSpec(w_qkv.shape, lambda b: (0, 0, 0)),
        pl.BlockSpec(b_qkv.shape, lambda b: (0, 0, 0)),
        pl.BlockSpec(w_out_t.shape, lambda b: (0, 0)),
        pl.BlockSpec(b_out2.shape, lambda b: (0, 0)),
        pl.BlockSpec(ln_g2.shape, lambda b: (0, 0)),
        pl.BlockSpec(ln_b2.shape, lambda b: (0, 0)),
    ]

    kernel = functools.partial(cross_attn_kernel, nhead=NHEAD,
                               has_qpos=has_qpos, has_pos=has_pos)
    out = pl.pallas_call(
        kernel,
        out_shape=jax.ShapeDtypeStruct((n, lq, d), tgt.dtype),
        grid=(n,),
        in_specs=in_specs,
        out_specs=pl.BlockSpec((None, lq, d), lambda b: (b, 0, 0)),
        compiler_params=pltpu.CompilerParams(dimension_semantics=("parallel",)),
    )(*args)
    return jnp.transpose(out, (1, 0, 2))             # back to (LQ, N, D)


def init_params(key):
    """Deterministic init matching the module's _reset_parameters:
       xavier_uniform_ on matrices, zero biases, LN weight=1/bias=0."""
    k1, k2 = jax.random.split(key)
    bnd_in = math.sqrt(6.0 / (D_MODEL + 3 * D_MODEL))
    w_in = jax.random.uniform(k1, (3 * D_MODEL, D_MODEL), jnp.float32, -bnd_in, bnd_in)
    b_in = jnp.zeros((3 * D_MODEL,), jnp.float32)
    bnd_out = math.sqrt(6.0 / (D_MODEL + D_MODEL))
    w_out = jax.random.uniform(k2, (D_MODEL, D_MODEL), jnp.float32, -bnd_out, bnd_out)
    b_out = jnp.zeros((D_MODEL,), jnp.float32)
    ln_g = jnp.ones((D_MODEL,), jnp.float32)
    ln_b = jnp.zeros((D_MODEL,), jnp.float32)
    return (w_in, b_in, w_out, b_out, ln_g, ln_b)


def reference(tgt, memory, params, pos, query_pos):
    """Pure-JAX f32 reference of forward_post for correctness checking."""
    w_in, b_in, w_out, b_out, ln_g, ln_b = params
    q = tgt + query_pos
    k = memory + pos
    v = memory

    def proj(x, w, b):
        return jnp.einsum('lnd,ed->lne', x, w) + b

    qp = proj(q, w_in[:D_MODEL], b_in[:D_MODEL])
    kp = proj(k, w_in[D_MODEL:2 * D_MODEL], b_in[D_MODEL:2 * D_MODEL])
    vp = proj(v, w_in[2 * D_MODEL:], b_in[2 * D_MODEL:])

    def split(x):
        L, Nb, _ = x.shape
        return x.reshape(L, Nb, NHEAD, HEAD_DIM).transpose(1, 2, 0, 3)

    qh, kh, vh = split(qp), split(kp), split(vp)
    s = jnp.einsum('nhqd,nhkd->nhqk', qh, kh) / math.sqrt(HEAD_DIM)
    p = jax.nn.softmax(s, axis=-1)
    o = jnp.einsum('nhqk,nhkd->nhqd', p, vh)
    o = o.transpose(2, 0, 1, 3).reshape(tgt.shape[0], tgt.shape[1], D_MODEL)
    o = jnp.einsum('lnd,ed->lne', o, w_out) + b_out
    y = tgt + o
    mean = y.mean(-1, keepdims=True)
    var = ((y - mean) ** 2).mean(-1, keepdims=True)
    return (y - mean) / jnp.sqrt(var + EPS) * ln_g + ln_b


# TODO(synk): memory_mask / memory_key_padding_mask are not implemented (None path only).

if __name__ == "__main__":
    key = jax.random.PRNGKey(0)
    kp, kt, km, kpo, kqp = jax.random.split(key, 5)

    params = init_params(kp)
    prepared = prepare_params(params)           # one-time weight layout / bf16 cast

    tgt = jax.random.normal(kt, (LQ, N, D_MODEL), jnp.float32)
    memory = jax.random.normal(km, (LK, N, D_MODEL), jnp.float32)
    pos = jax.random.normal(kpo, (LK, N, D_MODEL), jnp.float32)
    query_pos = jax.random.normal(kqp, (LQ, N, D_MODEL), jnp.float32)

    layer = jax.jit(cross_attention_layer)
    out = layer(tgt, memory, prepared, pos=pos, query_pos=query_pos)
    out = jax.block_until_ready(out)

    ref = reference(tgt, memory, params, pos, query_pos)
    assert out.shape == (LQ, N, D_MODEL)
    # Tolerance loosened vs f32 reference: bf16 MXU operands + approx reciprocal.
    np.testing.assert_allclose(np.asarray(out), np.asarray(ref), rtol=3e-2, atol=3e-2)
    print("KERNEL_OK")
</pallas_src>

<mosaic_0001>
module attributes {stable_mosaic.version = 11 : i64} {
  func.func @cross_attn_kernel(%arg0: i32, %arg1: memref<1x8x32xf32, #tpu.memory_space<vmem>>, %arg2: memref<1x8x32xf32, #tpu.memory_space<vmem>>, %arg3: memref<1x16x32xf32, #tpu.memory_space<vmem>>, %arg4: memref<1x16x32xf32, #tpu.memory_space<vmem>>, %arg5: memref<3x32x32xbf16, #tpu.memory_space<vmem>>, %arg6: memref<3x1x32xf32, #tpu.memory_space<vmem>>, %arg7: memref<32x32xbf16, #tpu.memory_space<vmem>>, %arg8: memref<1x32xf32, #tpu.memory_space<vmem>>, %arg9: memref<1x32xf32, #tpu.memory_space<vmem>>, %arg10: memref<1x32xf32, #tpu.memory_space<vmem>>, %arg11: memref<1x8x32xf32, #tpu.memory_space<vmem>>) attributes {dimension_semantics = [#tpu.dimension_semantics<parallel>], iteration_bounds = array<i64: 2>, scalar_prefetch = 0 : i64, scratch_operands = 0 : i64, tpu.core_type = #tpu.core_type<tc>, window_params = [{transform_indices = @transform_0, window_bounds = array<i64: 1, 8, 32>}, {transform_indices = @transform_1, window_bounds = array<i64: 1, 8, 32>}, {transform_indices = @transform_2, window_bounds = array<i64: 1, 16, 32>}, {transform_indices = @transform_3, window_bounds = array<i64: 1, 16, 32>}, {pipeline_mode = #tpu.pipeline_mode<synchronous>, transform_indices = @transform_4, window_bounds = array<i64: 3, 32, 32>}, {pipeline_mode = #tpu.pipeline_mode<synchronous>, transform_indices = @transform_5, window_bounds = array<i64: 3, 1, 32>}, {pipeline_mode = #tpu.pipeline_mode<synchronous>, transform_indices = @transform_6, window_bounds = array<i64: 32, 32>}, {pipeline_mode = #tpu.pipeline_mode<synchronous>, transform_indices = @transform_7, window_bounds = array<i64: 1, 32>}, {pipeline_mode = #tpu.pipeline_mode<synchronous>, transform_indices = @transform_8, window_bounds = array<i64: 1, 32>}, {pipeline_mode = #tpu.pipeline_mode<synchronous>, transform_indices = @transform_9, window_bounds = array<i64: 1, 32>}, {transform_indices = @transform_10, window_bounds = array<i64: 1, 8, 32>}]} {
    %c0 = arith.constant 0 : index
    %c0_0 = arith.constant 0 : index
    %c0_1 = arith.constant 0 : index
    %0 = vector.load %arg1[%c0, %c0_0, %c0_1] : memref<1x8x32xf32, #tpu.memory_space<vmem>>, vector<1x8x32xf32>
    %1 = vector.shape_cast %0 : vector<1x8x32xf32> to vector<8x32xf32>
    %c0_2 = arith.constant 0 : index
    %c0_3 = arith.constant 0 : index
    %c0_4 = arith.constant 0 : index
    %2 = vector.load %arg2[%c0_2, %c0_3, %c0_4] : memref<1x8x32xf32, #tpu.memory_space<vmem>>, vector<1x8x32xf32>
    %3 = vector.shape_cast %2 : vector<1x8x32xf32> to vector<8x32xf32>
    %4 = arith.addf %1, %3 : vector<8x32xf32>
    %c0_5 = arith.constant 0 : index
    %c0_6 = arith.constant 0 : index
    %c0_7 = arith.constant 0 : index
    %5 = vector.load %arg3[%c0_5, %c0_6, %c0_7] : memref<1x16x32xf32, #tpu.memory_space<vmem>>, vector<1x16x32xf32>
    %6 = vector.shape_cast %5 : vector<1x16x32xf32> to vector<16x32xf32>
    %c0_8 = arith.constant 0 : index
    %c0_9 = arith.constant 0 : index
    %c0_10 = arith.constant 0 : index
    %7 = vector.load %arg4[%c0_8, %c0_9, %c0_10] : memref<1x16x32xf32, #tpu.memory_space<vmem>>, vector<1x16x32xf32>
    %8 = vector.shape_cast %7 : vector<1x16x32xf32> to vector<16x32xf32>
    %9 = arith.addf %6, %8 : vector<16x32xf32>
    %c0_11 = arith.constant 0 : index
    %c0_12 = arith.constant 0 : index
    %c0_13 = arith.constant 0 : index
    %10 = vector.load %arg5[%c0_11, %c0_12, %c0_13] : memref<3x32x32xbf16, #tpu.memory_space<vmem>>, vector<1x32x32xbf16>
    %11 = vector.shape_cast %10 : vector<1x32x32xbf16> to vector<32x32xbf16>
    %c1 = arith.constant 1 : index
    %c0_14 = arith.constant 0 : index
    %c0_15 = arith.constant 0 : index
    %12 = vector.load %arg5[%c1, %c0_14, %c0_15] : memref<3x32x32xbf16, #tpu.memory_space<vmem>>, vector<1x32x32xbf16>
    %13 = vector.shape_cast %12 : vector<1x32x32xbf16> to vector<32x32xbf16>
    %c2 = arith.constant 2 : index
    %c0_16 = arith.constant 0 : index
    %c0_17 = arith.constant 0 : index
    %14 = vector.load %arg5[%c2, %c0_16, %c0_17] : memref<3x32x32xbf16, #tpu.memory_space<vmem>>, vector<1x32x32xbf16>
    %15 = vector.shape_cast %14 : vector<1x32x32xbf16> to vector<32x32xbf16>
    %c0_18 = arith.constant 0 : index
    %c0_19 = arith.constant 0 : index
    %c0_20 = arith.constant 0 : index
    %16 = vector.load %arg6[%c0_18, %c0_19, %c0_20] : memref<3x1x32xf32, #tpu.memory_space<vmem>>, vector<1x1x32xf32>
    %17 = vector.shape_cast %16 : vector<1x1x32xf32> to vector<1x32xf32>
    %c1_21 = arith.constant 1 : index
    %c0_22 = arith.constant 0 : index
    %c0_23 = arith.constant 0 : index
    %18 = vector.load %arg6[%c1_21, %c0_22, %c0_23] : memref<3x1x32xf32, #tpu.memory_space<vmem>>, vector<1x1x32xf32>
    %19 = vector.shape_cast %18 : vector<1x1x32xf32> to vector<1x32xf32>
    %c2_24 = arith.constant 2 : index
    %c0_25 = arith.constant 0 : index
    %c0_26 = arith.constant 0 : index
    %20 = vector.load %arg6[%c2_24, %c0_25, %c0_26] : memref<3x1x32xf32, #tpu.memory_space<vmem>>, vector<1x1x32xf32>
    %21 = vector.shape_cast %20 : vector<1x1x32xf32> to vector<1x32xf32>
    %22 = arith.truncf %4 : vector<8x32xf32> to vector<8x32xbf16>
    %cst = arith.constant dense<0.000000e+00> : vector<8x32xf32>
    %23 = tpu.matmul %22, %11, %cst {dimension_numbers = #tpu.dot_dimension_numbers<[1], [0], [0], [1], [0, 0, 1, 1], [], []>} : vector<8x32xbf16>, vector<32x32xbf16>, vector<8x32xf32> -> vector<8x32xf32>
    %24 = vector.broadcast %17 : vector<1x32xf32> to vector<8x32xf32>
    %25 = arith.addf %23, %24 : vector<8x32xf32>
    %26 = arith.truncf %9 : vector<16x32xf32> to vector<16x32xbf16>
    %cst_27 = arith.constant dense<0.000000e+00> : vector<16x32xf32>
    %27 = tpu.matmul %26, %13, %cst_27 {dimension_numbers = #tpu.dot_dimension_numbers<[1], [0], [0], [1], [0, 0, 1, 1], [], []>} : vector<16x32xbf16>, vector<32x32xbf16>, vector<16x32xf32> -> vector<16x32xf32>
    %28 = vector.broadcast %19 : vector<1x32xf32> to vector<16x32xf32>
    %29 = arith.addf %27, %28 : vector<16x32xf32>
    %30 = arith.truncf %6 : vector<16x32xf32> to vector<16x32xbf16>
    %cst_28 = arith.constant dense<0.000000e+00> : vector<16x32xf32>
    %31 = tpu.matmul %30, %15, %cst_28 {dimension_numbers = #tpu.dot_dimension_numbers<[1], [0], [0], [1], [0, 0, 1, 1], [], []>} : vector<16x32xbf16>, vector<32x32xbf16>, vector<16x32xf32> -> vector<16x32xf32>
    %32 = vector.broadcast %21 : vector<1x32xf32> to vector<16x32xf32>
    %33 = arith.addf %31, %32 : vector<16x32xf32>
    %34 = arith.truncf %25 : vector<8x32xf32> to vector<8x32xbf16>
    %35 = arith.truncf %29 : vector<16x32xf32> to vector<16x32xbf16>
    %36 = arith.truncf %33 : vector<16x32xf32> to vector<16x32xbf16>
    %37 = vector.extract_strided_slice %34 {offsets = [0, 0], sizes = [8, 8], strides = [1, 1]} : vector<8x32xbf16> to vector<8x8xbf16>
    %38 = vector.extract_strided_slice %35 {offsets = [0, 0], sizes = [16, 8], strides = [1, 1]} : vector<16x32xbf16> to vector<16x8xbf16>
    %cst_29 = arith.constant dense<0.000000e+00> : vector<8x16xf32>
    %39 = tpu.matmul %37, %38, %cst_29 {dimension_numbers = #tpu.dot_dimension_numbers<[1], [1], [0], [0], [0, 0, 1, 0], [], []>} : vector<8x8xbf16>, vector<16x8xbf16>, vector<8x16xf32> -> vector<8x16xf32>
    %cst_30 = arith.constant dense<0xFF800000> : vector<8xf32>
    %40 = vector.multi_reduction <maximumf>, %39, %cst_30 [1] : vector<8x16xf32> to vector<8xf32>
    %41 = vector.shape_cast %40 : vector<8xf32> to vector<8x1xf32>
    %42 = vector.broadcast %41 : vector<8x1xf32> to vector<8x16xf32>
    %43 = arith.subf %39, %42 : vector<8x16xf32>
    %44 = math.exp %43 : vector<8x16xf32>
    %cst_31 = arith.constant dense<0.000000e+00> : vector<8xf32>
    %45 = vector.multi_reduction <add>, %44, %cst_31 [1] : vector<8x16xf32> to vector<8xf32>
    %46 = vector.shape_cast %45 : vector<8xf32> to vector<8x1xf32>
    %47 = tpu.reciprocal %46 {approx = true} : vector<8x1xf32> -> vector<8x1xf32>
    %48 = vector.broadcast %47 : vector<8x1xf32> to vector<8x16xf32>
    %49 = arith.mulf %44, %48 : vector<8x16xf32>
    %50 = arith.truncf %49 : vector<8x16xf32> to vector<8x16xbf16>
    %51 = vector.extract_strided_slice %36 {offsets = [0, 0], sizes = [16, 8], strides = [1, 1]} : vector<16x32xbf16> to vector<16x8xbf16>
    %cst_32 = arith.constant dense<0.000000e+00> : vector<8x8xf32>
    %52 = tpu.matmul %50, %51, %cst_32 {dimension_numbers = #tpu.dot_dimension_numbers<[1], [0], [0], [1], [0, 0, 1, 1], [], []>} : vector<8x16xbf16>, vector<16x8xbf16>, vector<8x8xf32> -> vector<8x8xf32>
    %53 = vector.extract_strided_slice %34 {offsets = [0, 8], sizes = [8, 8], strides = [1, 1]} : vector<8x32xbf16> to vector<8x8xbf16>
    %54 = vector.extract_strided_slice %35 {offsets = [0, 8], sizes = [16, 8], strides = [1, 1]} : vector<16x32xbf16> to vector<16x8xbf16>
    %cst_33 = arith.constant dense<0.000000e+00> : vector<8x16xf32>
    %55 = tpu.matmul %53, %54, %cst_33 {dimension_numbers = #tpu.dot_dimension_numbers<[1], [1], [0], [0], [0, 0, 1, 0], [], []>} : vector<8x8xbf16>, vector<16x8xbf16>, vector<8x16xf32> -> vector<8x16xf32>
    %cst_34 = arith.constant dense<0xFF800000> : vector<8xf32>
    %56 = vector.multi_reduction <maximumf>, %55, %cst_34 [1] : vector<8x16xf32> to vector<8xf32>
    %57 = vector.shape_cast %56 : vector<8xf32> to vector<8x1xf32>
    %58 = vector.broadcast %57 : vector<8x1xf32> to vector<8x16xf32>
    %59 = arith.subf %55, %58 : vector<8x16xf32>
    %60 = math.exp %59 : vector<8x16xf32>
    %cst_35 = arith.constant dense<0.000000e+00> : vector<8xf32>
    %61 = vector.multi_reduction <add>, %60, %cst_35 [1] : vector<8x16xf32> to vector<8xf32>
    %62 = vector.shape_cast %61 : vector<8xf32> to vector<8x1xf32>
    %63 = tpu.reciprocal %62 {approx = true} : vector<8x1xf32> -> vector<8x1xf32>
    %64 = vector.broadcast %63 : vector<8x1xf32> to vector<8x16xf32>
    %65 = arith.mulf %60, %64 : vector<8x16xf32>
    %66 = arith.truncf %65 : vector<8x16xf32> to vector<8x16xbf16>
    %67 = vector.extract_strided_slice %36 {offsets = [0, 8], sizes = [16, 8], strides = [1, 1]} : vector<16x32xbf16> to vector<16x8xbf16>
    %cst_36 = arith.constant dense<0.000000e+00> : vector<8x8xf32>
    %68 = tpu.matmul %66, %67, %cst_36 {dimension_numbers = #tpu.dot_dimension_numbers<[1], [0], [0], [1], [0, 0, 1, 1], [], []>} : vector<8x16xbf16>, vector<16x8xbf16>, vector<8x8xf32> -> vector<8x8xf32>
    %69 = vector.extract_strided_slice %34 {offsets = [0, 16], sizes = [8, 8], strides = [1, 1]} : vector<8x32xbf16> to vector<8x8xbf16>
    %70 = vector.extract_strided_slice %35 {offsets = [0, 16], sizes = [16, 8], strides = [1, 1]} : vector<16x32xbf16> to vector<16x8xbf16>
    %cst_37 = arith.constant dense<0.000000e+00> : vector<8x16xf32>
    %71 = tpu.matmul %69, %70, %cst_37 {dimension_numbers = #tpu.dot_dimension_numbers<[1], [1], [0], [0], [0, 0, 1, 0], [], []>} : vector<8x8xbf16>, vector<16x8xbf16>, vector<8x16xf32> -> vector<8x16xf32>
    %cst_38 = arith.constant dense<0xFF800000> : vector<8xf32>
    %72 = vector.multi_reduction <maximumf>, %71, %cst_38 [1] : vector<8x16xf32> to vector<8xf32>
    %73 = vector.shape_cast %72 : vector<8xf32> to vector<8x1xf32>
    %74 = vector.broadcast %73 : vector<8x1xf32> to vector<8x16xf32>
    %75 = arith.subf %71, %74 : vector<8x16xf32>
    %76 = math.exp %75 : vector<8x16xf32>
    %cst_39 = arith.constant dense<0.000000e+00> : vector<8xf32>
    %77 = vector.multi_reduction <add>, %76, %cst_39 [1] : vector<8x16xf32> to vector<8xf32>
    %78 = vector.shape_cast %77 : vector<8xf32> to vector<8x1xf32>
    %79 = tpu.reciprocal %78 {approx = true} : vector<8x1xf32> -> vector<8x1xf32>
    %80 = vector.broadcast %79 : vector<8x1xf32> to vector<8x16xf32>
    %81 = arith.mulf %76, %80 : vector<8x16xf32>
    %82 = arith.truncf %81 : vector<8x16xf32> to vector<8x16xbf16>
    %83 = vector.extract_strided_slice %36 {offsets = [0, 16], sizes = [16, 8], strides = [1, 1]} : vector<16x32xbf16> to vector<16x8xbf16>
    %cst_40 = arith.constant dense<0.000000e+00> : vector<8x8xf32>
    %84 = tpu.matmul %82, %83, %cst_40 {dimension_numbers = #tpu.dot_dimension_numbers<[1], [0], [0], [1], [0, 0, 1, 1], [], []>} : vector<8x16xbf16>, vector<16x8xbf16>, vector<8x8xf32> -> vector<8x8xf32>
    %85 = vector.extract_strided_slice %34 {offsets = [0, 24], sizes = [8, 8], strides = [1, 1]} : vector<8x32xbf16> to vector<8x8xbf16>
    %86 = vector.extract_strided_slice %35 {offsets = [0, 24], sizes = [16, 8], strides = [1, 1]} : vector<16x32xbf16> to vector<16x8xbf16>
    %cst_41 = arith.constant dense<0.000000e+00> : vector<8x16xf32>
    %87 = tpu.matmul %85, %86, %cst_41 {dimension_numbers = #tpu.dot_dimension_numbers<[1], [1], [0], [0], [0, 0, 1, 0], [], []>} : vector<8x8xbf16>, vector<16x8xbf16>, vector<8x16xf32> -> vector<8x16xf32>
    %cst_42 = arith.constant dense<0xFF800000> : vector<8xf32>
    %88 = vector.multi_reduction <maximumf>, %87, %cst_42 [1] : vector<8x16xf32> to vector<8xf32>
    %89 = vector.shape_cast %88 : vector<8xf32> to vector<8x1xf32>
    %90 = vector.broadcast %89 : vector<8x1xf32> to vector<8x16xf32>
    %91 = arith.subf %87, %90 : vector<8x16xf32>
    %92 = math.exp %91 : vector<8x16xf32>
    %cst_43 = arith.constant dense<0.000000e+00> : vector<8xf32>
    %93 = vector.multi_reduction <add>, %92, %cst_43 [1] : vector<8x16xf32> to vector<8xf32>
    %94 = vector.shape_cast %93 : vector<8xf32> to vector<8x1xf32>
    %95 = tpu.reciprocal %94 {approx = true} : vector<8x1xf32> -> vector<8x1xf32>
    %96 = vector.broadcast %95 : vector<8x1xf32> to vector<8x16xf32>
    %97 = arith.mulf %92, %96 : vector<8x16xf32>
    %98 = arith.truncf %97 : vector<8x16xf32> to vector<8x16xbf16>
    %99 = vector.extract_strided_slice %36 {offsets = [0, 24], sizes = [16, 8], strides = [1, 1]} : vector<16x32xbf16> to vector<16x8xbf16>
    %cst_44 = arith.constant dense<0.000000e+00> : vector<8x8xf32>
    %100 = tpu.matmul %98, %99, %cst_44 {dimension_numbers = #tpu.dot_dimension_numbers<[1], [0], [0], [1], [0, 0, 1, 1], [], []>} : vector<8x16xbf16>, vector<16x8xbf16>, vector<8x8xf32> -> vector<8x8xf32>
    %101 = tpu.concatenate %52, %68, %84, %100 in 1 : vector<8x8xf32>, vector<8x8xf32>, vector<8x8xf32>, vector<8x8xf32> -> vector<8x32xf32>
    %102 = arith.truncf %101 : vector<8x32xf32> to vector<8x32xbf16>
    %c0_45 = arith.constant 0 : index
    %c0_46 = arith.constant 0 : index
    %103 = vector.load %arg7[%c0_45, %c0_46] : memref<32x32xbf16, #tpu.memory_space<vmem>>, vector<32x32xbf16>
    %cst_47 = arith.constant dense<0.000000e+00> : vector<8x32xf32>
    %104 = tpu.matmul %102, %103, %cst_47 {dimension_numbers = #tpu.dot_dimension_numbers<[1], [0], [0], [1], [0, 0, 1, 1], [], []>} : vector<8x32xbf16>, vector<32x32xbf16>, vector<8x32xf32> -> vector<8x32xf32>
    %c0_48 = arith.constant 0 : index
    %c0_49 = arith.constant 0 : index
    %105 = vector.load %arg8[%c0_48, %c0_49] : memref<1x32xf32, #tpu.memory_space<vmem>>, vector<1x32xf32>
    %106 = vector.broadcast %105 : vector<1x32xf32> to vector<8x32xf32>
    %107 = arith.addf %104, %106 : vector<8x32xf32>
    %108 = arith.addf %1, %107 : vector<8x32xf32>
    %cst_50 = arith.constant dense<0.000000e+00> : vector<8xf32>
    %109 = vector.multi_reduction <add>, %108, %cst_50 [1] : vector<8x32xf32> to vector<8xf32>
    %110 = vector.shape_cast %109 : vector<8xf32> to vector<8x1xf32>
    %cst_51 = arith.constant 3.200000e+01 : f32
    %111 = vector.broadcast %cst_51 : f32 to vector<8x1xf32>
    %112 = arith.divf %110, %111 : vector<8x1xf32>
    %113 = arith.mulf %108, %108 : vector<8x32xf32>
    %cst_52 = arith.constant dense<0.000000e+00> : vector<8xf32>
    %114 = vector.multi_reduction <add>, %113, %cst_52 [1] : vector<8x32xf32> to vector<8xf32>
    %115 = vector.shape_cast %114 : vector<8xf32> to vector<8x1xf32>
    %cst_53 = arith.constant 3.200000e+01 : f32
    %116 = vector.broadcast %cst_53 : f32 to vector<8x1xf32>
    %117 = arith.divf %115, %116 : vector<8x1xf32>
    %118 = arith.mulf %112, %112 : vector<8x1xf32>
    %119 = arith.subf %117, %118 : vector<8x1xf32>
    %120 = vector.broadcast %112 : vector<8x1xf32> to vector<8x32xf32>
    %121 = arith.subf %108, %120 : vector<8x32xf32>
    %cst_54 = arith.constant 9.99999974E-6 : f32
    %122 = vector.broadcast %cst_54 : f32 to vector<8x1xf32>
    %123 = arith.addf %119, %122 : vector<8x1xf32>
    %124 = math.rsqrt %123 : vector<8x1xf32>
    %125 = vector.broadcast %124 : vector<8x1xf32> to vector<8x32xf32>
    %126 = arith.mulf %121, %125 : vector<8x32xf32>
    %c0_55 = arith.constant 0 : index
    %c0_56 = arith.constant 0 : index
    %127 = vector.load %arg9[%c0_55, %c0_56] : memref<1x32xf32, #tpu.memory_space<vmem>>, vector<1x32xf32>
    %128 = vector.broadcast %127 : vector<1x32xf32> to vector<8x32xf32>
    %129 = arith.mulf %126, %128 : vector<8x32xf32>
    %c0_57 = arith.constant 0 : index
    %c0_58 = arith.constant 0 : index
    %130 = vector.load %arg10[%c0_57, %c0_58] : memref<1x32xf32, #tpu.memory_space<vmem>>, vector<1x32xf32>
    %131 = vector.broadcast %130 : vector<1x32xf32> to vector<8x32xf32>
    %132 = arith.addf %129, %131 : vector<8x32xf32>
    %c0_59 = arith.constant 0 : index
    %c0_60 = arith.constant 0 : index
    %c0_61 = arith.constant 0 : index
    %133 = vector.load %arg11[%c0_59, %c0_60, %c0_61] : memref<1x8x32xf32, #tpu.memory_space<vmem>>, vector<1x8x32xf32>
    %134 = vector.shape_cast %133 : vector<1x8x32xf32> to vector<8x32xf32>
    %135 = vector.shape_cast %132 : vector<8x32xf32> to vector<1x8x32xf32>
    tpu.vector_store %arg11[%c0_59, %c0_60, %c0_61], %135 {strides = array<i32>} : memref<1x8x32xf32, #tpu.memory_space<vmem>>, vector<1x8x32xf32>,
    return
  }
  func.func @transform_0(%arg0: i32) -> (i32, i32, i32) {
    %c0_i32 = arith.constant 0 : i32
    %c0_i32_0 = arith.constant 0 : i32
    %c0_i32_1 = arith.constant 0 : i32
    return %arg0, %c0_i32, %c0_i32_0 : i32, i32, i32
  }
  func.func @transform_1(%arg0: i32) -> (i32, i32, i32) {
    %c0_i32 = arith.constant 0 : i32
    %c0_i32_0 = arith.constant 0 : i32
    %c0_i32_1 = arith.constant 0 : i32
    return %arg0, %c0_i32, %c0_i32_0 : i32, i32, i32
  }
  func.func @transform_2(%arg0: i32) -> (i32, i32, i32) {
    %c0_i32 = arith.constant 0 : i32
    %c0_i32_0 = arith.constant 0 : i32
    %c0_i32_1 = arith.constant 0 : i32
    return %arg0, %c0_i32, %c0_i32_0 : i32, i32, i32
  }
  func.func @transform_3(%arg0: i32) -> (i32, i32, i32) {
    %c0_i32 = arith.constant 0 : i32
    %c0_i32_0 = arith.constant 0 : i32
    %c0_i32_1 = arith.constant 0 : i32
    return %arg0, %c0_i32, %c0_i32_0 : i32, i32, i32
  }
  func.func @transform_4(%arg0: i32) -> (i32, i32, i32) {
    %c0_i32 = arith.constant 0 : i32
    %c0_i32_0 = arith.constant 0 : i32
    %c0_i32_1 = arith.constant 0 : i32
    %c0_i32_2 = arith.constant 0 : i32
    return %c0_i32, %c0_i32_0, %c0_i32_1 : i32, i32, i32
  }
  func.func @transform_5(%arg0: i32) -> (i32, i32, i32) {
    %c0_i32 = arith.constant 0 : i32
    %c0_i32_0 = arith.constant 0 : i32
    %c0_i32_1 = arith.constant 0 : i32
    %c0_i32_2 = arith.constant 0 : i32
    return %c0_i32, %c0_i32_0, %c0_i32_1 : i32, i32, i32
  }
  func.func @transform_6(%arg0: i32) -> (i32, i32) {
    %c0_i32 = arith.constant 0 : i32
    %c0_i32_0 = arith.constant 0 : i32
    %c0_i32_1 = arith.constant 0 : i32
    return %c0_i32, %c0_i32_0 : i32, i32
  }
  func.func @transform_7(%arg0: i32) -> (i32, i32) {
    %c0_i32 = arith.constant 0 : i32
    %c0_i32_0 = arith.constant 0 : i32
    %c0_i32_1 = arith.constant 0 : i32
    return %c0_i32, %c0_i32_0 : i32, i32
  }
  func.func @transform_8(%arg0: i32) -> (i32, i32) {
    %c0_i32 = arith.constant 0 : i32
    %c0_i32_0 = arith.constant 0 : i32
    %c0_i32_1 = arith.constant 0 : i32
    return %c0_i32, %c0_i32_0 : i32, i32
  }
  func.func @transform_9(%arg0: i32) -> (i32, i32) {
    %c0_i32 = arith.constant 0 : i32
    %c0_i32_0 = arith.constant 0 : i32
    %c0_i32_1 = arith.constant 0 : i32
    return %c0_i32, %c0_i32_0 : i32, i32
  }
  func.func @transform_10(%arg0: i32) -> (i32, i32, i32) {
    %c0_i32 = arith.constant 0 : i32
    %c0_i32_0 = arith.constant 0 : i32
    %c0_i32_1 = arith.constant 0 : i32
    return %arg0, %c0_i32, %c0_i32_0 : i32, i32, i32
  }
}

</mosaic_0001>

<bundles_post_ra>
// kernel: cross_attention_layer.1
= control target key start
LH: loop header
LB: loop body
LE: loop exit
PB: predicated region body
PF: predicated region fallthrough
CT: control target
= control target key end

     0   :  { %s1542_s13 = smov 0   ;;  %s1697_s0 = inlined_call_operand.vmem [shape: f32[2,8,32], index: 0, kind: input, shape index: {}]   ;;  %s1698_s1 = inlined_call_operand.vmem [shape: f32[2,8,32], index: 1, kind: input, shape index: {}]   ;;  %s1699_s2 = inlined_call_operand.vmem [shape: f32[2,16,32], index: 2, kind: input, shape index: {}]   ;;  %s1700_s3 = inlined_call_operand.vmem [shape: f32[2,16,32], index: 3, kind: input, shape index: {}]   ;;  %s1701_s4 = inlined_call_operand.vmem [shape: bf16[3,32,32], index: 4, kind: input, shape index: {}]   ;;  %s1702_s5 = inlined_call_operand.vmem [shape: f32[3,1,32], index: 5, kind: input, shape index: {}]   ;;  %s1703_s6 = inlined_call_operand.vmem [shape: bf16[32,32], index: 6, kind: input, shape index: {}]   ;;  %s1704_s7 = inlined_call_operand.vmem [shape: f32[1,32], index: 7, kind: input, shape index: {}]   ;;  %s1705_s8 = inlined_call_operand.vmem [shape: f32[1,32], index: 8, kind: input, shape index: {}]   ;;  %s1706_s9 = inlined_call_operand.vmem [shape: f32[1,32], index: 9, kind: input, shape index: {}]   ;;  %s1707_s10 = inlined_call_operand.vmem [shape: f32[2,8,32], index: 10, kind: output, shape index: {}]  }
   0x1 LB: > { %s1269_s14 = sadd.s32 4294967295, %s1477_s13   ;;  %p1273_p0 = scmp.ge.s32.totalorder %s1477_s13, 1  ;;  %s1477_s13 = sphi %s1542_s13, %s20_s13  }
   0x2   : > { %p340_p1 = scmp.lt.s32.totalorder %s1477_s13, 3 }
   0x4   : > { %p341_p2 = pnand %p1273_p0, %p340_p1 }
   0x5   : > { %p390_p3 = scmp.lt.s32.totalorder (!%p341_p2), %s1269_s14, 1  ;;  %s1481_s22 = smov (!%p341_p2), 112  }
   0x6   : > { %344 = sbr.rel (%p341_p2) target bundleno = 1543 (0x607), region = 60  ;;  %s1483_s25 = smov (!%p341_p2), 104  }
   0x7   : > { %s1484_s15 = smov (!%p341_p2), 8   ;;  %s1485_s18 = smov (!%p341_p2), 16  }
   0x8   : > { %s1486_s19 = smov (!%p341_p2), 24  }
   0xb   : > { %v1445_v0 = vld [vmem:[%s1701_s4 + $0x18] sm:$0xff]   ;;  %v1479_v1 = vmov 0.0   ;;  %v1446_v2 = vld [vmem:[%s1701_s4 + $0x10] sm:$0xff]   ;;  %v1447_v3 = vld [vmem:[%s1701_s4 + $0x8] sm:$0xff]   ;;  %vm1480_vm0 = vmmov 0   ;;  %s1709_s14 = smov (!%p390_p3, %s1269_s14), 1 }
   0xc   : > { %1357 = vmatprep.subr.bf16.mxu1 %v1479_v1  ;;  %1349 = vmatprep.subr.bf16.mxu0 %v1479_v1  ;;  %v1448_v4 = vld [vmem:[%s1701_s4] sm:$0xff]   ;;  %s1319_s23 = sshll.u32 %s1709_s14, 4  ;;  %s1570_s24 = sshll.u32 %s1709_s14, 3  ;;  %vm460_vm1 = vcmask 261120   ;;  %vm633_vm2 = vcmask 64512   ;;  %v1449_v33 = vld [vmem:[%s1701_s4 + $0x28] sm:$0xff]  }
   0xd   : > { %1358 = vmatpush3.bf16.msra.mxu1 %v1445_v0  ;;  %1361 = vmatprep.mubr.msk.bf16.mxu1 %vm1480_vm0, %v1479_v1  ;;  %s402_s27 = scalar_lea.vmem %s1699_s2, %s1319_s23  ;;  %s407_s30 = scalar_lea.vmem %s1700_s3, %s1319_s23  ;;  %v1295_v19 = vld [vmem:[%s1702_s5 + $0x1] ss:$0 sm:$0xff]  ;;  %v1291_v21 = vld [vmem:[%s1702_s5] ss:$0 sm:$0xff]  ;;  %vm680_vm3 = vcmask 130048   ;;  %vm1077_vm4 = vcmask 195584  }
   0xe   : > { %1359 = vmatprep.subr.bf16.mxu1 %v1479_v1  ;;  %1353 = vmatprep.mubr.msk.bf16.mxu0 %vm1480_vm0, %v1479_v1  ;;  %v416_v5 = vld [vmem:[%s402_s27] sm:$0xff]  ;;  %v417_v6 = vld [vmem:[%s402_s27 + $0x8] sm:$0xff]  ;;  %s393_s14 = scalar_lea.vmem %s1697_s0, %s1570_s24  ;;  %s397_s17 = scalar_lea.vmem %s1698_s1, %s1570_s24 }
   0xf   : > { %1350 = vmatpush3.bf16.msra.mxu0 %v1447_v3  ;;  %v418_v7 = vld [vmem:[%s407_s30] sm:$0xff]  ;;  %v419_v8 = vld [vmem:[%s407_s30 + $0x8] sm:$0xff]  ;;  %v567_v10 = vpack.c.bf16 %v417_v6, %v416_v5  ;;  %s1482_s23 = smov 120   ;;  %s411_s29 = scalar_lea.vmem %s1707_s10, %s1570_s24 }
  0x10   : > { %1351 = vmatprep.subr.bf16.mxu0 %v1479_v1  ;;  %v420_v9 = vadd.f32 %v418_v7, %v416_v5  ;;  %v1587_v11 = vld [vmem:[%s393_s14] sm:$0xff]  ;;  %v421_v13 = vadd.f32 %v419_v8, %v417_v6 }
  0x11   : > { %1360 = vmatpush3.bf16.msra.mxu1 %v1446_v2  ;;  %v414_v12 = vld [vmem:[%s397_s17] sm:$0xff] }
  0x12   : > { %1373 = vmatprep.subr.bf16.mxu1 %v1479_v1  ;;  %v415_v14 = vadd.f32 %v414_v12, %v1587_v11  ;;  %v504_v15 = vpack.c.bf16 %v421_v13, %v420_v9  ;;  %v1450_v34 = vld [vmem:[%s1701_s4 + $0x20] sm:$0xff]  }
  0x13   : > { %1352 = vmatpush3.bf16.msra.mxu0 %v1448_v4  ;;  %v1299_v49 = vld [vmem:[%s1702_s5 + $0x2] ss:$0 sm:$0xff] }
  0x14   : > { %1365 = vmatprep.subr.bf16.mxu0 %v1479_v1  ;;  %v441_v16 = vpack.c.bf16 %v415_v14, %v415_v14  ;;  %1362 = vmatmul.mubr.msk.bf16.vlgmr.msra.gmra.mxu1 %vm460_vm1, %v504_v15 }
  0x15   : > { %1375 = vmatprep.mubr.msk.bf16.mxu1 %vm1480_vm0, %v1479_v1 }
  0x16   : > { %1354 = vmatmul.mubr.msk.bf16.vlgmr.msra.gmra.mxu0 %vm460_vm1, %v441_v16 }
  0x17   : > { %1369 = vmatprep.mubr.msk.bf16.mxu0 %vm1480_vm0, %v1479_v1  ;;  %1366 = vmatpush3.bf16.msra.mxu0 %v1449_v33 }
  0x18   : > { %1367 = vmatprep.subr.bf16.mxu0 %v1479_v1 }
  0x1b   : > { %1368 = vmatpush3.bf16.msra.mxu0 %v1450_v34 }
  0x1c   : > { %1379 = vmatprep.subr.bf16.mxu0 %v1479_v1 }
  0x1e   : > { %1370 = vmatmul.mubr.msk.bf16.vlgmr.msra.gmra.mxu0 %vm460_vm1, %v567_v10 }
  0x1f   : > { %1381 = vmatprep.mubr.msk.bf16.mxu0 %vm1480_vm0, %v1479_v1 }
  0xd4   : > { %v560_v17 = vpop.f32.mrf.mxu1 }
  0xd5   : > { %v561_v25 = vadd.f32 %v1295_v19, %v560_v17 }
  0xd6   : > { %v498_v18 = vpop.f32.mrf.mxu0  ;;  %v1363_v20 = vpop.f32.mrf.mxu1 }
  0xd7   : > { %v499_v27 = vadd.f32 %v1291_v21, %v498_v18 }
  0xd8   : > { %v1355_v22 = vpop.f32.mrf.mxu0  ;;  %v563_v23 = vpop.f32.mrf.mxu1 }
  0xd9   : > { %v564_v26 = vadd.f32 %v1295_v19, %v563_v23  ;;  %v630_v31 = vpack.c.bf16 %v499_v27, %v499_v27 }
  0xda   : > { %v501_v24 = vpop.f32.mrf.mxu0  ;;  %v1364_v28 = vpop.f32.mrf.mxu1 }
  0xdb   : > { %v631_v30 = vpack.c.bf16 %v564_v26, %v561_v25 }
  0xdc   : > { %v1356_v29 = vpop.f32.mrf.mxu0 }
  0xdd   : > { %849 = vrot.lane.b32.xlu1 %v631_v30, %s1481_s22  ;;  %740 = vrot.lane.b32.xlu0 %v631_v30, %s1482_s23  ;;  %v638_v32 = vsel %vm633_vm2, %v631_v30, 0 }
  0xde   : > { %1374 = vmatpush3.bf16.xpose.msra.mxu1 %v638_v32  ;;  %v623_v50 = vpop.f32.mrf.mxu0 }
  0xdf   : > { %1385 = vmatprep.subr.bf16.mxu1 %v1479_v1  ;;  %v624_v52 = vadd.f32 %v1299_v49, %v623_v50 }
  0xe0   : > { %v1371_v51 = vpop.f32.mrf.mxu0 }
  0xe1   : > { %847 = vrot.lane.b32.xlu1 %v630_v31, %s1481_s22  ;;  %737 = vrot.lane.b32.xlu0 %v630_v31, %s1482_s23 }
  0xe2   : > { %v626_v53 = vpop.f32.mrf.mxu0 }
  0xe3   : > { %v627_v54 = vadd.f32 %v1299_v49, %v626_v53  ;;  %v1451_v53 = vld [vmem:[%s1703_s6 + $0x8] sm:$0xff]  }
  0xe4   : > { %v1372_v55 = vpop.f32.mrf.mxu0 }
  0xe5   : > { %955 = vrot.lane.b32.xlu1 %v630_v31, %s1483_s25  ;;  %957 = vrot.lane.b32.xlu0 %v631_v30, %s1483_s25  ;;  %v632_v56 = vpack.c.bf16 %v627_v54, %v624_v52 }
  0xe6   : > { %1376 = vmatmul.mubr.msk.bf16.vlgmr.msra.gmra.mxu1 %vm633_vm2, %v630_v31 }
  0xe7   : > { %1387 = vmatprep.mubr.msk.bf16.mxu1 %vm1480_vm0, %v1479_v1  ;;  %1380 = vmatpush3.bf16.msra.mxu0 %v632_v56 }
  0xe8   : > { %1391 = vmatprep.subr.bf16.mxu0 %v1479_v1 }
 0x14f   : > { %v741_v35 = vpop.permute.xlu0 %740  ;;  %v850_v37 = vpop.permute.xlu1 %849 }
 0x150   : > { %v746_v36 = vsel %vm633_vm2, %v741_v35, 0  ;;  %v855_v39 = vsel %vm633_vm2, %v850_v37, 0 }
 0x151   : > { %1386 = vmatpush3.bf16.xpose.msra.mxu1 %v746_v36 }
 0x152   : > { %1397 = vmatprep.subr.bf16.mxu1 %v1479_v1 }
 0x153   : > { %v738_v38 = vpop.permute.xlu0 %737  ;;  %v848_v41 = vpop.permute.xlu1 %847 }
 0x157   : > { %v958_v40 = vpop.permute.xlu0 %957  ;;  %v956_v43 = vpop.permute.xlu1 %955 }
 0x158   : > { %1388 = vmatmul.mubr.msk.bf16.vlgmr.msra.gmra.mxu1 %vm633_vm2, %v738_v38  ;;  %v963_v42 = vsel %vm633_vm2, %v958_v40, 0 }
 0x159   : > { %1398 = vmatpush3.bf16.xpose.msra.mxu1 %v855_v39  ;;  %1399 = vmatprep.mubr.msk.bf16.mxu1 %vm1480_vm0, %v1479_v1 }
 0x15a   : > { %1409 = vmatprep.subr.bf16.mxu1 %v1479_v1 }
 0x160   : > { %1400 = vmatmul.mubr.msk.bf16.vlgmr.msra.gmra.mxu1 %vm633_vm2, %v848_v41 }
 0x161   : > { %1410 = vmatpush3.bf16.xpose.msra.mxu1 %v963_v42  ;;  %1411 = vmatprep.mubr.msk.bf16.mxu1 %vm1480_vm0, %v1479_v1 }
 0x162   : > { %1421 = vmatprep.subr.bf16.mxu1 %v1479_v1 }
 0x168   : > { %1412 = vmatmul.mubr.msk.bf16.vlgmr.msra.gmra.mxu1 %vm633_vm2, %v956_v43 }
 0x169   : > { %1425 = vmatprep.mubr.msk.bf16.mxu1 %vm1480_vm0, %v1479_v1  ;;  %1422 = vmatpush3.bf16.msra.mxu1 %v1451_v53 }
 0x16a   : > { %1423 = vmatprep.subr.bf16.mxu1 %v1479_v1 }
 0x1a6   : > { %v674_v44 = vpop.f32.mrf.mxu1 }
 0x1a7   : > { %v681_v45 = vsel %vm680_vm3, %v674_v44, -inf }
 0x1a8   : > { %682 = vmax.xlane.f32.xlu0 %v681_v45  ;;  %v1377_v46 = vpop.f32.mrf.mxu1 }
 0x1aa   : > { %v677_v47 = vpop.f32.mrf.mxu1 }
 0x1ac   : > { %v1378_v48 = vpop.f32.mrf.mxu1 }
 0x218   : > { %v782_v57 = vpop.f32.mrf.mxu1 }
 0x219   : > { %v788_v58 = vsel %vm680_vm3, %v782_v57, -inf }
 0x21a   : > { %789 = vmax.xlane.f32.xlu1 %v788_v58  ;;  %v1389_v59 = vpop.f32.mrf.mxu1 }
 0x21c   : > { %v785_v60 = vpop.f32.mrf.mxu1 }
 0x21e   : > { %v1390_v61 = vpop.f32.mrf.mxu1 }
 0x220   : > { %v891_v62 = vpop.f32.mrf.mxu1 }
 0x221   : > { %v897_v63 = vsel %vm680_vm3, %v891_v62, -inf }
 0x222   : > { %898 = vmax.xlane.f32.xlu0 %v897_v63  ;;  %v1401_v0 = vpop.f32.mrf.mxu1 }
 0x224   : > { %v894_v2 = vpop.f32.mrf.mxu1 }
 0x226   : > { %v1402_v3 = vpop.f32.mrf.mxu1 }
 0x228   : > { %v999_v4 = vpop.f32.mrf.mxu1 }
 0x229   : > { %v1005_v5 = vsel %vm680_vm3, %v999_v4, -inf }
 0x22a   : > { %1006 = vmax.xlane.f32.xlu0 %v1005_v5  ;;  %v1413_v6 = vpop.f32.mrf.mxu1 }
 0x22c   : > { %v1002_v7 = vpop.f32.mrf.mxu1 }
 0x22e   : > { %v1414_v8 = vpop.f32.mrf.mxu1 }
 0x231   : > { %v683_v9 = vpop.xlane.xlu0 %682 }
 0x232   : > { %v684_v10 = vsub.f32 %v674_v44, %v683_v9 }
 0x234   : > { %v685_v12 = vmul.f32 1.442695, %v684_v10  ;;  %v1311_v10 = vld [vmem:[%s1704_s7] ss:$0 sm:$0xff] }
 0x236   : > { %1453 = vpow2.f32 %v685_v12 }
 0x243   : > { %v1454_v13 = vpop.eup %1453 }
 0x244   : > { %v687_v14 = vsel %vm680_vm3, %v1454_v13, 0.0 }
 0x245   : > { %688 = vadd.xlane.f32.xlu1 %v687_v14 }
 0x256   : > { %801 = vrot.lane.b32.xlu1 %v632_v56, %s1482_s23 }
 0x2a3   : > { %v790_v15 = vpop.xlane.xlu1 %789 }
 0x2a4   : > { %v791_v16 = vsub.f32 %v782_v57, %v790_v15 }
 0x2a6   : > { %v792_v17 = vmul.f32 1.442695, %v791_v16 }
 0x2a8   : > { %1455 = vpow2.f32 %v792_v17 }
 0x2ab   : > { %v899_v18 = vpop.xlane.xlu0 %898 }
 0x2ac   : > { %v900_v19 = vsub.f32 %v891_v62, %v899_v18 }
 0x2ae   : > { %v901_v20 = vmul.f32 1.442695, %v900_v19 }
 0x2b0   : > { %1457 = vpow2.f32 %v901_v20 }
 0x2b3   : > { %v1007_v21 = vpop.xlane.xlu0 %1006 }
 0x2b4   : > { %v1008_v22 = vsub.f32 %v999_v4, %v1007_v21 }
 0x2b5   : > { %v1456_v23 = vpop.eup %1455 }
 0x2b6   : > { %v1009_v24 = vmul.f32 1.442695, %v1008_v22  ;;  %v794_v25 = vsel %vm680_vm3, %v1456_v23, 0.0 }
 0x2b7   : > { %795 = vadd.xlane.f32.xlu0 %v794_v25 }
 0x2b8   : > { %1459 = vpow2.f32 %v1009_v24 }
 0x2bd   : > { %v1458_v26 = vpop.eup %1457 }
 0x2be   : > { %v903_v27 = vsel %vm680_vm3, %v1458_v26, 0.0 }
 0x2bf   : > { %904 = vadd.xlane.f32.xlu1 %v903_v27 }
 0x2c5   : > { %v1460_v28 = vpop.eup %1459 }
 0x2c6   : > { %v1011_v29 = vsel %vm680_vm3, %v1460_v28, 0.0 }
 0x2c7   : > { %1012 = vadd.xlane.f32.xlu0 %v1011_v29  ;;  %v1315_v29 = vld [vmem:[%s1705_s8] ss:$0 sm:$0xff] }
 0x2ce   : > { %v689_v30 = vpop.xlane.xlu1 %688 }
 0x2cf   : > { %1461 = vrcp.f32 %v689_v30 }
 0x2d0   : > { %1017 = vrot.lane.b32.xlu1 %v632_v56, %s1483_s25 }
 0x2d2   : > { %v802_v34 = vpop.permute.xlu1 %801 }
 0x2dc   : > { %v1462_v31 = vpop.eup %1461 }
 0x2dd   : > { %909 = vrot.lane.b32.xlu0 %v632_v56, %s1481_s22  ;;  %v691_v32 = vmul.f32 %v1462_v31, %v1454_v13  ;;  %v1452_v56 = vld [vmem:[%s1703_s6] sm:$0xff]  }
 0x2de   : > { %1424 = vmatpush3.bf16.msra.mxu1 %v1452_v56  ;;  %v1316_v31 = vld [vmem:[%s1706_s9] ss:$0 sm:$0xff] }
 0x2df   : > { %v692_v33 = vpack.c.bf16 %v691_v32, %v691_v32 }
 0x2e1   : > { %1382 = vmatmul.mubr.msk.bf16.vlgmr.msra.gmra.mxu0 %vm680_vm3, %v692_v33 }
 0x2e2   : > { %1392 = vmatpush3.bf16.msra.mxu0 %v802_v34  ;;  %1393 = vmatprep.mubr.msk.bf16.mxu0 %vm1480_vm0, %v1479_v1 }
 0x2e3   : > { %1403 = vmatprep.subr.bf16.mxu0 %v1479_v1 }
 0x340   : > { %v796_v35 = vpop.xlane.xlu0 %795 }
 0x341   : > { %1463 = vrcp.f32 %v796_v35 }
 0x348   : > { %v905_v36 = vpop.xlane.xlu1 %904 }
 0x349   : > { %1465 = vrcp.f32 %v905_v36 }
 0x34c   : > { %v1018_v45 = vpop.permute.xlu1 %1017 }
 0x34e   : > { %v1464_v37 = vpop.eup %1463 }
 0x34f   : > { %v798_v38 = vmul.f32 %v1464_v37, %v1456_v23 }
 0x350   : > { %v1013_v39 = vpop.xlane.xlu0 %1012 }
 0x351   : > { %1467 = vrcp.f32 %v1013_v39  ;;  %v799_v40 = vpack.c.bf16 %v798_v38, %v798_v38 }
 0x353   : > { %1394 = vmatmul.mubr.msk.bf16.vlgmr.msra.gmra.mxu0 %vm680_vm3, %v799_v40 }
 0x354   : > { %v910_v41 = vpop.permute.xlu0 %909  ;;  %1405 = vmatprep.mubr.msk.bf16.mxu0 %vm1480_vm0, %v1479_v1 }
 0x355   : > { %1404 = vmatpush3.bf16.msra.mxu0 %v910_v41 }
 0x356   : > { %v1466_v42 = vpop.eup %1465  ;;  %1415 = vmatprep.subr.bf16.mxu0 %v1479_v1 }
 0x357   : > { %v907_v43 = vmul.f32 %v1466_v42, %v1458_v26 }
 0x359   : > { %v908_v44 = vpack.c.bf16 %v907_v43, %v907_v43 }
 0x35b   : > { %1406 = vmatmul.mubr.msk.bf16.vlgmr.msra.gmra.mxu0 %vm680_vm3, %v908_v44 }
 0x35c   : > { %1416 = vmatpush3.bf16.msra.mxu0 %v1018_v45  ;;  %1417 = vmatprep.mubr.msk.bf16.mxu0 %vm1480_vm0, %v1479_v1 }
 0x35e   : > { %v1468_v46 = vpop.eup %1467 }
 0x35f   : > { %v1015_v47 = vmul.f32 %v1468_v46, %v1460_v28 }
 0x361   : > { %v1016_v48 = vpack.c.bf16 %v1015_v47, %v1015_v47 }
 0x363   : > { %1418 = vmatmul.mubr.msk.bf16.vlgmr.msra.gmra.mxu0 %vm680_vm3, %v1016_v48 }
 0x3a1   : > { %v730_v49 = vpop.f32.mrf.mxu0 }
 0x3a3   : > { %v1383_v50 = vpop.f32.mrf.mxu0 }
 0x3a5   : > { %v733_v51 = vpop.f32.mrf.mxu0 }
 0x3a7   : > { %v1384_v52 = vpop.f32.mrf.mxu0 }
 0x413   : > { %v841_v54 = vpop.f32.mrf.mxu0 }
 0x414   : > { %1064 = vrot.lane.b32.xlu1 %v841_v54, %s1484_s15 }
 0x415   : > { %v1395_v55 = vpop.f32.mrf.mxu0 }
 0x417   : > { %v844_v57 = vpop.f32.mrf.mxu0 }
 0x419   : > { %v1396_v58 = vpop.f32.mrf.mxu0 }
 0x41b   : > { %v949_v59 = vpop.f32.mrf.mxu0 }
 0x41c   : > { %1068 = vrot.lane.b32.xlu0 %v949_v59, %s1485_s18 }
 0x41d   : > { %v1407_v60 = vpop.f32.mrf.mxu0 }
 0x41f   : > { %v952_v61 = vpop.f32.mrf.mxu0 }
 0x421   : > { %v1408_v62 = vpop.f32.mrf.mxu0 }
 0x423   : > { %v1057_v63 = vpop.f32.mrf.mxu0 }
 0x424   : > { %1072 = vrot.lane.b32.xlu1 %v1057_v63, %s1486_s19 }
 0x425   : > { %v1419_v1 = vpop.f32.mrf.mxu0 }
 0x427   : > { %v1060_v0 = vpop.f32.mrf.mxu0 }
 0x429   : > { %v1420_v2 = vpop.f32.mrf.mxu0 }
 0x486   : > { %v1065_v3 = vpop.permute.xlu1 %1064 }
 0x487   : > { %v1075_v5 = vsel %vm633_vm2, %v730_v49, %v1065_v3 }
 0x48e   : > { %v1069_v4 = vpop.permute.xlu0 %1068 }
 0x48f   : > { %v1076_v6 = vsel %vm680_vm3, %v1075_v5, %v1069_v4 }
 0x496   : > { %v1073_v7 = vpop.permute.xlu1 %1072 }
 0x497   : > { %v1078_v8 = vsel %vm1077_vm4, %v1076_v6, %v1073_v7 }
 0x498   : > { %v1079_v9 = vpack.c.bf16 %v1078_v8, %v1078_v8 }
 0x49a   : > { %1426 = vmatmul.mubr.msk.bf16.vlgmr.msra.gmra.mxu1 %vm460_vm1, %v1079_v9 }
 0x55a   : > { %v1140_v12 = vpop.f32.mrf.mxu1 }
 0x55b   : > { %v1141_v13 = vadd.f32 %v1311_v10, %v1140_v12 }
 0x55c   : > { %v1427_v14 = vpop.f32.mrf.mxu1 }
 0x55d   : > { %v1146_v15 = vadd.f32 %v1141_v13, %v1587_v11 }
 0x55e   : > { %v1143_v16 = vpop.f32.mrf.mxu1 }
 0x55f   : > { %v1147_v17 = vsel %vm460_vm1, %v1146_v15, 0.0  ;;  %v1152_v18 = vmul.f32 %v1146_v15, %v1146_v15 }
 0x560   : > { %1148 = vadd.xlane.f32.xlu0 %v1147_v17  ;;  %v1428_v19 = vpop.f32.mrf.mxu1 }
 0x561   : > { %v1153_v20 = vsel %vm460_vm1, %v1152_v18, 0.0 }
 0x562   : > { %1154 = vadd.xlane.f32.xlu1 %v1153_v20 }
 0x5e9   : > { %v1149_v21 = vpop.xlane.xlu0 %1148 }
 0x5ea   : > { %v1151_v22 = vmul.f32 0.03125, %v1149_v21 }
 0x5eb   : > { %v1155_v23 = vpop.xlane.xlu1 %1154 }
 0x5ec   : > { %v1157_v24 = vmul.f32 %v1151_v22, %v1151_v22  ;;  %v1156_v25 = vmul.f32 0.03125, %v1155_v23  ;;  %v1159_v28 = vsub.f32 %v1146_v15, %v1151_v22 }
 0x5ee   : > { %v1158_v26 = vsub.f32 %v1156_v25, %v1157_v24 }
 0x5f0   : > { %v1160_v27 = vadd.f32 1e-05, %v1158_v26 }
 0x5f2   : > { %1469 = vrsqrt.f32 %v1160_v27 }
 0x5ff   : > { %v1470_v11 = vpop.eup %1469 }
 0x600   : > { %v1162_v30 = vmul.f32 %v1470_v11, %v1159_v28 }
 0x602   : > { %v1170_v32 = vmul.f32 %v1315_v29, %v1162_v30 }
 0x604   : > { %v1178_v33 = vadd.f32 %v1316_v31, %v1170_v32 }
 0x606   : > { %1179 = vst.msk [vmem:[%s411_s29] sm:$0xff] %vm460_vm1, %v1178_v33 }
 0x607 PF: > { %s20_s13 = sadd.s32 1, %s1477_s13  }
 0x608   : > { %p17_p4 = scmp.ge.s32.totalorder %s20_s13, 4  }
 0x60a   :  { %19 = sbr.rel (!%p17_p4) target bundleno = 1 (0x1), region = 103 }

</bundles_post_ra>
